<compile_context>
chip_gen: v7x
topology: tpu7x:2x2x1
jax: 0.10.0
libtpu: 0.0.40
codegen_flags: <defaults>
</compile_context>

<pallas_src>
import functools

import jax
import jax.numpy as jnp
import numpy as np
from jax import lax
from jax.experimental import pallas as pl
from jax.experimental.pallas import tpu as pltpu

_LANE = 128


# ---------------------------------------------------------------------------
# tile / VMEM sizing helpers (generation-aware)
# ---------------------------------------------------------------------------

def _round_up(x, m):
    return (x + m - 1) // m * m


def _vmem_capacity_bytes():
    try:
        return int(pltpu.get_tpu_info().vmem_capacity_bytes)
    except Exception:
        return 64 * 1024 * 1024          # conservative default (v7x per-TC VMEM)


def _plan_feature_tiling(d, batch, itemsize, accum_bytes, allow_split=True):
    """Pad D to a lane multiple, optionally split it across a leading
    'parallel' grid axis (v7x: 2 TensorCores), and pick the largest
    128-multiple feature tile whose double-buffered source+target blocks fit
    the remaining VMEM budget."""
    d128 = _round_up(max(d, 1), _LANE)
    n_tiles = d128 // _LANE
    # Use 2 splits unless it would force > ~12.5% zero-padding overhead.
    if allow_split and n_tiles >= 2 and (n_tiles % 2 == 0 or n_tiles >= 8):
        num_splits = 2
    else:
        num_splits = 1
    d_padded = _round_up(d128, num_splits * _LANE)
    d_split = d_padded // num_splits

    cap = _vmem_capacity_bytes()
    # Budget for double-buffered input blocks: leave room for the resident
    # accumulators/outputs and compiler headroom.
    budget = max(int(cap * 0.7) - accum_bytes, 4 * 1024 * 1024)
    per_128_lanes = 2 * 2 * batch * _LANE * itemsize   # 2 inputs x 2 buffers
    max_lane_tiles = max(1, budget // per_128_lanes)
    tile_d = min(d_split // _LANE, max_lane_tiles) * _LANE
    tile_d = max(tile_d, _LANE)
    while d_split % tile_d != 0:                       # keep a divisor of d_split
        tile_d -= _LANE
    return d_padded, num_splits, d_split, tile_d, cap


def _vmem_limit(block_bytes, accum_bytes, cap):
    est = 2 * block_bytes + 2 * accum_bytes + (4 << 20)
    return int(min(max(est, 32 << 20), int(cap * 0.9)))


def _pad_features(x, d_padded):
    d = x.shape[1]
    if d == d_padded:
        return x
    return jnp.pad(x, ((0, 0), (0, d_padded - d)))


# ---------------------------------------------------------------------------
# RBF (gaussian multi-kernel) MMD — Pallas Gram build + tiny JAX epilogue
# ---------------------------------------------------------------------------

def _gram_kernel(src_ref, tgt_ref, ss_ref, st_ref, tt_ref):
    """Accumulate the three unique Gram quadrants for one feature tile."""
    j = pl.program_id(1)

    @pl.when(j == 0)
    def _init():
        ss_ref[...] = jnp.zeros_like(ss_ref)
        st_ref[...] = jnp.zeros_like(st_ref)
        tt_ref[...] = jnp.zeros_like(tt_ref)

    # Native-dtype tiles straight into the MXU; f32 accumulation.
    src = src_ref[...]          # (B, TD)
    tgt = tgt_ref[...]          # (B, TD)
    dims = (((1,), (1,)), ((), ()))   # contract over the feature tile
    # TODO(synk): inspect pl.lower_as_mlir for a per-step XLU transpose of the
    # RHS; switch to pl.dot(..., trans_b=True) if Mosaic materializes one.
    ss_ref[...] += lax.dot_general(src, src, dims,
                                   preferred_element_type=jnp.float32)
    st_ref[...] += lax.dot_general(src, tgt, dims,
                                   preferred_element_type=jnp.float32)
    tt_ref[...] += lax.dot_general(tgt, tgt, dims,
                                   preferred_element_type=jnp.float32)


def _rbf_loss_from_grams(gram_ss, gram_st, gram_tt, batch, kernel_mul,
                         kernel_num, fix_sigma=None):
    """O(B^2) epilogue in plain JAX (bandwidth, kernels, quadrant means)."""
    n = 2 * batch
    s_sq = jnp.diagonal(gram_ss).reshape(batch, 1)   # ||x_i||^2
    t_sq = jnp.diagonal(gram_tt).reshape(batch, 1)   # ||y_i||^2
    l2_ss = jnp.maximum(s_sq + s_sq.T - 2.0 * gram_ss, 0.0)
    l2_st = jnp.maximum(s_sq + t_sq.T - 2.0 * gram_st, 0.0)
    l2_tt = jnp.maximum(t_sq + t_sq.T - 2.0 * gram_tt, 0.0)
    if fix_sigma:
        bandwidth = jnp.asarray(fix_sigma, dtype=jnp.float32)
    else:
        # sum over the full (2B, 2B) distance matrix (TS block = ST^T).
        total_l2 = l2_ss.sum() + l2_tt.sum() + 2.0 * l2_st.sum()
        bandwidth = total_l2 / float(n * n - n)
    bandwidth = bandwidth / (kernel_mul ** (kernel_num // 2))
    k_ss = sum(jnp.exp(-l2_ss / (bandwidth * kernel_mul ** i))
               for i in range(kernel_num))
    k_st = sum(jnp.exp(-l2_st / (bandwidth * kernel_mul ** i))
               for i in range(kernel_num))
    k_tt = sum(jnp.exp(-l2_tt / (bandwidth * kernel_mul ** i))
               for i in range(kernel_num))
    # mean(K_YX) == mean(K_XY) since K_YX = K_XY^T.
    return k_ss.mean() + k_tt.mean() - 2.0 * k_st.mean()


def mmd_rbf(source, target, kernel_mul=2.0, kernel_num=5, fix_sigma=None):
    assert source.ndim == 2 and source.shape == target.shape
    b, d = source.shape
    itemsize = jnp.dtype(source.dtype).itemsize
    # three resident (B, B) f32 accumulators (lane/sublane padded estimate)
    accum_bytes = 3 * _round_up(b, 8) * max(_round_up(b, _LANE), _LANE) * 4
    d_padded, num_splits, d_split, tile_d, cap = _plan_feature_tiling(
        d, b, itemsize, accum_bytes, allow_split=True)
    tiles_per_split = d_split // tile_d

    src = _pad_features(source, d_padded)
    tgt = _pad_features(target, d_padded)

    def in_spec():
        return pl.BlockSpec((b, tile_d),
                            lambda s, j: (0, s * tiles_per_split + j))

    def gram_spec():
        return pl.BlockSpec((None, b, b), lambda s, j: (s, 0, 0))

    gram_shape = jax.ShapeDtypeStruct((num_splits, b, b), jnp.float32)
    block_bytes = 2 * b * tile_d * itemsize

    partial_ss, partial_st, partial_tt = pl.pallas_call(
        _gram_kernel,
        out_shape=(gram_shape, gram_shape, gram_shape),
        grid_spec=pltpu.PrefetchScalarGridSpec(
            num_scalar_prefetch=0,
            grid=(num_splits, tiles_per_split),
            in_specs=[in_spec(), in_spec()],
            out_specs=[gram_spec(), gram_spec(), gram_spec()],
        ),
        compiler_params=pltpu.CompilerParams(
            # feature splits may run on separate TensorCores (v7x megacore);
            # the tile axis carries the resident Gram accumulators.
            dimension_semantics=("parallel", "arbitrary"),
            vmem_limit_bytes=_vmem_limit(block_bytes, accum_bytes, cap),
        ),
    )(src, tgt)

    gram_ss = partial_ss.sum(axis=0)
    gram_st = partial_st.sum(axis=0)
    gram_tt = partial_tt.sum(axis=0)
    # TODO(synk): for very large batch (3*B^2*4B approaching VMEM), switch the
    # Gram build to a (tm, tn)-tiled output written to HBM.
    return _rbf_loss_from_grams(gram_ss, gram_st, gram_tt, b,
                                float(kernel_mul), int(kernel_num), fix_sigma)


# ---------------------------------------------------------------------------
# Linear MMD:  || mean(X,0) - mean(Y,0) ||^2
# ---------------------------------------------------------------------------

def _mmd_linear_kernel(src_ref, tgt_ref, out_ref, acc_ref):
    j = pl.program_id(0)

    @pl.when(j == 0)
    def _init():
        acc_ref[...] = jnp.zeros_like(acc_ref)

    src = src_ref[...].astype(jnp.float32)   # reference does .float() here
    tgt = tgt_ref[...].astype(jnp.float32)
    delta = (jnp.mean(src, axis=0, keepdims=True)
             - jnp.mean(tgt, axis=0, keepdims=True))        # (1, TD)
    # per-lane VMEM accumulation (VPU only); single cross-lane reduce at end
    acc_ref[...] += delta * delta

    @pl.when(j == pl.num_programs(0) - 1)
    def _finish():
        out_ref[...] = jnp.broadcast_to(jnp.sum(acc_ref[...]), out_ref.shape)


def mmd_linear(source, target):
    assert source.ndim == 2 and source.shape == target.shape
    b, d = source.shape
    itemsize = jnp.dtype(source.dtype).itemsize
    d_padded, _, _, tile_d, cap = _plan_feature_tiling(
        d, b, itemsize, accum_bytes=1 << 20, allow_split=False)
    src = _pad_features(source, d_padded)
    tgt = _pad_features(target, d_padded)
    block_bytes = 2 * b * tile_d * itemsize

    out = pl.pallas_call(
        _mmd_linear_kernel,
        out_shape=jax.ShapeDtypeStruct((1, _LANE), jnp.float32),
        grid_spec=pltpu.PrefetchScalarGridSpec(
            num_scalar_prefetch=0,
            grid=(d_padded // tile_d,),
            in_specs=[pl.BlockSpec((b, tile_d), lambda j: (0, j)),
                      pl.BlockSpec((b, tile_d), lambda j: (0, j))],
            out_specs=pl.BlockSpec((1, _LANE), lambda j: (0, 0)),
            scratch_shapes=[pltpu.VMEM((1, tile_d), jnp.float32)],
        ),
        compiler_params=pltpu.CompilerParams(
            dimension_semantics=("arbitrary",),
            vmem_limit_bytes=_vmem_limit(block_bytes, 8 * tile_d * 4, cap),
        ),
    )(src, tgt)
    return out[0, 0]


def mmd_loss(source, target, kernel_type="rbf", kernel_mul=2.0, kernel_num=5,
             fix_sigma=None):
    """Forward pass of the PyTorch MMD module."""
    if kernel_type == "linear":
        return mmd_linear(source, target)
    return mmd_rbf(source, target, kernel_mul=kernel_mul,
                   kernel_num=kernel_num, fix_sigma=fix_sigma)


# ---------------------------------------------------------------------------
# Pure-JAX reference (mirrors the PyTorch forward exactly)
# ---------------------------------------------------------------------------

def mmd_ref(source, target, kernel_type="rbf", kernel_mul=2.0, kernel_num=5,
            fix_sigma=None):
    if kernel_type == "linear":
        delta = (source.astype(jnp.float32).mean(0)
                 - target.astype(jnp.float32).mean(0))
        return jnp.dot(delta, delta)
    b = source.shape[0]
    total = jnp.concatenate([source, target], axis=0).astype(jnp.float32)
    n = total.shape[0]
    l2 = jnp.sum((total[:, None, :] - total[None, :, :]) ** 2, axis=2)
    bandwidth = fix_sigma if fix_sigma else jnp.sum(l2) / (n * n - n)
    bandwidth = bandwidth / (kernel_mul ** (kernel_num // 2))
    kernels = sum(jnp.exp(-l2 / (bandwidth * kernel_mul ** i))
                  for i in range(kernel_num))
    xx = jnp.mean(kernels[:b, :b])
    yy = jnp.mean(kernels[b:, b:])
    xy = jnp.mean(kernels[:b, b:])
    yx = jnp.mean(kernels[b:, :b])
    return xx + yy - xy - yx


if __name__ == "__main__":
    key = jax.random.PRNGKey(0)
    k1, k2 = jax.random.split(key)
    B, D = 8, 256
    source = jax.random.normal(k1, (B, D), dtype=jnp.float32)
    target = jax.random.normal(k2, (B, D), dtype=jnp.float32) * 1.2 + 0.1

    # rbf (module default)
    loss_rbf = jax.block_until_ready(mmd_loss(source, target, kernel_type="rbf"))
    ref_rbf = jax.block_until_ready(mmd_ref(source, target, kernel_type="rbf"))
    np.testing.assert_allclose(np.asarray(loss_rbf), np.asarray(ref_rbf),
                               rtol=2e-3, atol=2e-4)

    # linear branch
    loss_lin = jax.block_until_ready(mmd_loss(source, target, kernel_type="linear"))
    ref_lin = jax.block_until_ready(mmd_ref(source, target, kernel_type="linear"))
    np.testing.assert_allclose(np.asarray(loss_lin), np.asarray(ref_lin),
                               rtol=2e-3, atol=2e-4)

    print("KERNEL_OK")
</pallas_src>

<mosaic_0001>
module attributes {stable_mosaic.version = 11 : i64} {
  func.func @_gram_kernel(%arg0: i32, %arg1: i32, %arg2: memref<8x128xf32, #tpu.memory_space<vmem>>, %arg3: memref<8x128xf32, #tpu.memory_space<vmem>>, %arg4: memref<1x8x8xf32, #tpu.memory_space<vmem>>, %arg5: memref<1x8x8xf32, #tpu.memory_space<vmem>>, %arg6: memref<1x8x8xf32, #tpu.memory_space<vmem>>) attributes {dimension_semantics = [#tpu.dimension_semantics<parallel>, #tpu.dimension_semantics<arbitrary>], iteration_bounds = array<i64: 2, 1>, scalar_prefetch = 0 : i64, scratch_operands = 0 : i64, tpu.core_type = #tpu.core_type<tc>, window_params = [{transform_indices = @transform_0, window_bounds = array<i64: 8, 128>}, {transform_indices = @transform_1, window_bounds = array<i64: 8, 128>}, {transform_indices = @transform_2, window_bounds = array<i64: 1, 8, 8>}, {transform_indices = @transform_3, window_bounds = array<i64: 1, 8, 8>}, {transform_indices = @transform_4, window_bounds = array<i64: 1, 8, 8>}]} {
    %c0_i32 = arith.constant 0 : i32
    %0 = arith.cmpi eq, %arg1, %c0_i32 : i32
    %1 = arith.extui %0 : i1 to i32
    %c0_i32_0 = arith.constant 0 : i32
    %2 = arith.cmpi ne, %1, %c0_i32_0 : i32
    scf.if %2 {
      %cst_24 = arith.constant 0.000000e+00 : f32
      %26 = vector.broadcast %cst_24 : f32 to vector<8x8xf32>
      %c0_25 = arith.constant 0 : index
      %c0_26 = arith.constant 0 : index
      %c0_27 = arith.constant 0 : index
      %27 = vector.load %arg4[%c0_25, %c0_26, %c0_27] : memref<1x8x8xf32, #tpu.memory_space<vmem>>, vector<1x8x8xf32>
      %28 = vector.shape_cast %27 : vector<1x8x8xf32> to vector<8x8xf32>
      %29 = vector.shape_cast %26 : vector<8x8xf32> to vector<1x8x8xf32>
      tpu.vector_store %arg4[%c0_25, %c0_26, %c0_27], %29 {strides = array<i32>} : memref<1x8x8xf32, #tpu.memory_space<vmem>>, vector<1x8x8xf32>,
      %cst_28 = arith.constant 0.000000e+00 : f32
      %30 = vector.broadcast %cst_28 : f32 to vector<8x8xf32>
      %c0_29 = arith.constant 0 : index
      %c0_30 = arith.constant 0 : index
      %c0_31 = arith.constant 0 : index
      %31 = vector.load %arg5[%c0_29, %c0_30, %c0_31] : memref<1x8x8xf32, #tpu.memory_space<vmem>>, vector<1x8x8xf32>
      %32 = vector.shape_cast %31 : vector<1x8x8xf32> to vector<8x8xf32>
      %33 = vector.shape_cast %30 : vector<8x8xf32> to vector<1x8x8xf32>
      tpu.vector_store %arg5[%c0_29, %c0_30, %c0_31], %33 {strides = array<i32>} : memref<1x8x8xf32, #tpu.memory_space<vmem>>, vector<1x8x8xf32>,
      %cst_32 = arith.constant 0.000000e+00 : f32
      %34 = vector.broadcast %cst_32 : f32 to vector<8x8xf32>
      %c0_33 = arith.constant 0 : index
      %c0_34 = arith.constant 0 : index
      %c0_35 = arith.constant 0 : index
      %35 = vector.load %arg6[%c0_33, %c0_34, %c0_35] : memref<1x8x8xf32, #tpu.memory_space<vmem>>, vector<1x8x8xf32>
      %36 = vector.shape_cast %35 : vector<1x8x8xf32> to vector<8x8xf32>
      %37 = vector.shape_cast %34 : vector<8x8xf32> to vector<1x8x8xf32>
      tpu.vector_store %arg6[%c0_33, %c0_34, %c0_35], %37 {strides = array<i32>} : memref<1x8x8xf32, #tpu.memory_space<vmem>>, vector<1x8x8xf32>,
    } else {
    }
    %c0 = arith.constant 0 : index
    %c0_1 = arith.constant 0 : index
    %3 = vector.load %arg2[%c0, %c0_1] : memref<8x128xf32, #tpu.memory_space<vmem>>, vector<8x128xf32>
    %c0_2 = arith.constant 0 : index
    %c0_3 = arith.constant 0 : index
    %4 = vector.load %arg3[%c0_2, %c0_3] : memref<8x128xf32, #tpu.memory_space<vmem>>, vector<8x128xf32>
    %c0_4 = arith.constant 0 : index
    %c0_5 = arith.constant 0 : index
    %c0_6 = arith.constant 0 : index
    %5 = vector.load %arg4[%c0_4, %c0_5, %c0_6] : memref<1x8x8xf32, #tpu.memory_space<vmem>>, vector<1x8x8xf32>
    %6 = vector.shape_cast %5 : vector<1x8x8xf32> to vector<8x8xf32>
    %cst = arith.constant dense<0.000000e+00> : vector<8x8xf32>
    %7 = tpu.matmul %3, %3, %cst {dimension_numbers = #tpu.dot_dimension_numbers<[1], [1], [0], [0], [0, 0, 1, 0], [], []>} : vector<8x128xf32>, vector<8x128xf32>, vector<8x8xf32> -> vector<8x8xf32>
    %8 = arith.addf %6, %7 : vector<8x8xf32>
    %c0_7 = arith.constant 0 : index
    %c0_8 = arith.constant 0 : index
    %c0_9 = arith.constant 0 : index
    %9 = vector.load %arg4[%c0_7, %c0_8, %c0_9] : memref<1x8x8xf32, #tpu.memory_space<vmem>>, vector<1x8x8xf32>
    %10 = vector.shape_cast %9 : vector<1x8x8xf32> to vector<8x8xf32>
    %11 = vector.shape_cast %8 : vector<8x8xf32> to vector<1x8x8xf32>
    tpu.vector_store %arg4[%c0_7, %c0_8, %c0_9], %11 {strides = array<i32>} : memref<1x8x8xf32, #tpu.memory_space<vmem>>, vector<1x8x8xf32>,
    %c0_10 = arith.constant 0 : index
    %c0_11 = arith.constant 0 : index
    %c0_12 = arith.constant 0 : index
    %12 = vector.load %arg5[%c0_10, %c0_11, %c0_12] : memref<1x8x8xf32, #tpu.memory_space<vmem>>, vector<1x8x8xf32>
    %13 = vector.shape_cast %12 : vector<1x8x8xf32> to vector<8x8xf32>
    %cst_13 = arith.constant dense<0.000000e+00> : vector<8x8xf32>
    %14 = tpu.matmul %3, %4, %cst_13 {dimension_numbers = #tpu.dot_dimension_numbers<[1], [1], [0], [0], [0, 0, 1, 0], [], []>} : vector<8x128xf32>, vector<8x128xf32>, vector<8x8xf32> -> vector<8x8xf32>
    %15 = arith.addf %13, %14 : vector<8x8xf32>
    %c0_14 = arith.constant 0 : index
    %c0_15 = arith.constant 0 : index
    %c0_16 = arith.constant 0 : index
    %16 = vector.load %arg5[%c0_14, %c0_15, %c0_16] : memref<1x8x8xf32, #tpu.memory_space<vmem>>, vector<1x8x8xf32>
    %17 = vector.shape_cast %16 : vector<1x8x8xf32> to vector<8x8xf32>
    %18 = vector.shape_cast %15 : vector<8x8xf32> to vector<1x8x8xf32>
    tpu.vector_store %arg5[%c0_14, %c0_15, %c0_16], %18 {strides = array<i32>} : memref<1x8x8xf32, #tpu.memory_space<vmem>>, vector<1x8x8xf32>,
    %c0_17 = arith.constant 0 : index
    %c0_18 = arith.constant 0 : index
    %c0_19 = arith.constant 0 : index
    %19 = vector.load %arg6[%c0_17, %c0_18, %c0_19] : memref<1x8x8xf32, #tpu.memory_space<vmem>>, vector<1x8x8xf32>
    %20 = vector.shape_cast %19 : vector<1x8x8xf32> to vector<8x8xf32>
    %cst_20 = arith.constant dense<0.000000e+00> : vector<8x8xf32>
    %21 = tpu.matmul %4, %4, %cst_20 {dimension_numbers = #tpu.dot_dimension_numbers<[1], [1], [0], [0], [0, 0, 1, 0], [], []>} : vector<8x128xf32>, vector<8x128xf32>, vector<8x8xf32> -> vector<8x8xf32>
    %22 = arith.addf %20, %21 : vector<8x8xf32>
    %c0_21 = arith.constant 0 : index
    %c0_22 = arith.constant 0 : index
    %c0_23 = arith.constant 0 : index
    %23 = vector.load %arg6[%c0_21, %c0_22, %c0_23] : memref<1x8x8xf32, #tpu.memory_space<vmem>>, vector<1x8x8xf32>
    %24 = vector.shape_cast %23 : vector<1x8x8xf32> to vector<8x8xf32>
    %25 = vector.shape_cast %22 : vector<8x8xf32> to vector<1x8x8xf32>
    tpu.vector_store %arg6[%c0_21, %c0_22, %c0_23], %25 {strides = array<i32>} : memref<1x8x8xf32, #tpu.memory_space<vmem>>, vector<1x8x8xf32>,
    return
  }
  func.func @transform_0(%arg0: i32, %arg1: i32) -> (i32, i32) {
    %c1_i32 = arith.constant 1 : i32
    %0 = arith.muli %arg0, %c1_i32 : i32
    %1 = arith.addi %0, %arg1 : i32
    %c0_i32 = arith.constant 0 : i32
    %c0_i32_0 = arith.constant 0 : i32
    return %c0_i32, %1 : i32, i32
  }
  func.func @transform_1(%arg0: i32, %arg1: i32) -> (i32, i32) {
    %c1_i32 = arith.constant 1 : i32
    %0 = arith.muli %arg0, %c1_i32 : i32
    %1 = arith.addi %0, %arg1 : i32
    %c0_i32 = arith.constant 0 : i32
    %c0_i32_0 = arith.constant 0 : i32
    return %c0_i32, %1 : i32, i32
  }
  func.func @transform_2(%arg0: i32, %arg1: i32) -> (i32, i32, i32) {
    %c0_i32 = arith.constant 0 : i32
    %c0_i32_0 = arith.constant 0 : i32
    %c0_i32_1 = arith.constant 0 : i32
    return %arg0, %c0_i32, %c0_i32_0 : i32, i32, i32
  }
  func.func @transform_3(%arg0: i32, %arg1: i32) -> (i32, i32, i32) {
    %c0_i32 = arith.constant 0 : i32
    %c0_i32_0 = arith.constant 0 : i32
    %c0_i32_1 = arith.constant 0 : i32
    return %arg0, %c0_i32, %c0_i32_0 : i32, i32, i32
  }
  func.func @transform_4(%arg0: i32, %arg1: i32) -> (i32, i32, i32) {
    %c0_i32 = arith.constant 0 : i32
    %c0_i32_0 = arith.constant 0 : i32
    %c0_i32_1 = arith.constant 0 : i32
    return %arg0, %c0_i32, %c0_i32_0 : i32, i32, i32
  }
}

</mosaic_0001>

<bundles_post_ra>
// kernel: tpu_custom_call.1
= control target key start
LH: loop header
LB: loop body
LE: loop exit
PB: predicated region body
PF: predicated region fallthrough
CT: control target
= control target key end

     0   :  { %s1408_s0 = inlined_call_operand.hbm [shape: f32[8,256], index: 0, kind: input, shape index: {}]   ;;  %s1409_s1 = inlined_call_operand.hbm [shape: f32[8,256], index: 1, kind: input, shape index: {}]   ;;  %s1410_s2 = inlined_call_operand.hbm [shape: f32[2,8,8], index: 2, kind: output, shape index: {0}]   ;;  %s1411_s3 = inlined_call_operand.hbm [shape: f32[2,8,8], index: 3, kind: output, shape index: {1}]   ;;  %s1412_s4 = inlined_call_operand.hbm [shape: f32[2,8,8], index: 4, kind: output, shape index: {2}]  }
   0x1   :  { %1416 = sst [smem:[#allocation15_spill]] %s1408_s0 }
   0x2   :  { %10 = vsyncpa [#allocation3], 0 }
   0x3   :  { %12 = vsyncpa [#allocation3 + $0x1], 0 }
   0x4   :  { %13 = vsyncpa [#allocation6], 0 }
   0x5   :  { %15 = vsyncpa [#allocation6 + $0x1], 0 }
   0x6   :  { %16 = vsyncpa [#allocation4], 0 }
   0x7   :  { %18 = vsyncpa [#allocation4 + $0x1], 0 }
   0x8   :  { %19 = vsyncpa [#allocation9], 0 }
   0x9   :  { %21 = vsyncpa [#allocation9 + $0x1], 0  ;;  %s1094_s15 = smov 0   ;;  %s1096_s16 = smov 0  }
   0xa   :  { %s1098_s17 = smov 0   ;;  %s1100_s18 = smov 0  }
   0xb   :  { %s1102_s19 = smov 0   ;;  %s1104_s20 = smov 0  }
   0xc LB: > { %s1125_s21 = sadd.s32 4294967295, %s1060_s20   ;;  %s1413_s22 = sadd.s32 4294967294, %s1060_s20   ;;  %s1060_s20 = sphi %s1104_s20, %s27_s20   ;;  %s1056_s19 = sphi %s1102_s19, %s1436_s19   ;;  %s1052_s18 = sphi %s1100_s18, %s1435_s18   ;;  %s1048_s17 = sphi %s1098_s17, %s1434_s17   ;;  %s1044_s16 = sphi %s1096_s16, %s1433_s16   ;;  %s1040_s15 = sphi %s1094_s15, %s1432_s15  }
   0xd   : > { %s39_s23 = sadd.s32 1, %s1056_s19  ;;  %s48_s24 = sadd.s32 1, %s1048_s17 }
   0xe   : > { %p41_p0 = scmp.ge.s32.totalorder %s39_s23, 2  ;;  %p55_p1 = scmp.ne.s32.totalorder %s1048_s17, %s1044_s16 }
   0xf   : > { %p56_p2 = scmp.eq.s32.totalorder %s1060_s20, 0  ;;  %p61_p3 = scmp.ne.s32.totalorder %s1044_s16, %s1040_s15 }
  0x10   : > { %s1438_s23 = smov (%p41_p0, %s39_s23), 0  ;;  %p62_p5 = scmp.eq.s32.totalorder %s1125_s21, 0 }
  0x11   : > { %p1137_p4 = por %p56_p2, %p55_p1  ;;  %s45_s26 = ssub.s32 %s1056_s19, %s1438_s23 }
  0x12   : > { %p113_p6 = scmp.eq.s32.totalorder %s1125_s21, 1  ;;  %p46_p7 = scmp.eq.s32.totalorder %s45_s26, 0 }
  0x13   : > { %p1145_p8 = por %p62_p5, %p61_p3  ;;  %p119_p10 = scmp.eq.s32.totalorder %s1413_s22, 1 }
  0x14   : > { %p1149_p9 = por %p113_p6, %p55_p1  ;;  %p802_p13 = scmp.lt.s32.totalorder %s1060_s20, 2 }
  0x15   : > { %s1418_s27 = scalar_select %p1145_p8, 1, 0 }
  0x16   : > { %s1419_s28 = scalar_select %p1149_p9, 1, 0 }
  0x17   : > { %s1156_s29 = scalar_select %p46_p7, %s1048_s17, %s48_s24  }
  0x18   : > { %p1158_p11 = por %p119_p10, %p61_p3  ;;  %s1165_s5 = sand.u32 1, %s1048_s17  }
  0x19   : > { %s736_s6 = sshll.u32 %s1165_s5, 3  ;;  %s737_s7 = sshll.u32 %s1056_s19, 7 }
  0x1a   : > { %s1420_s30 = scalar_select %p1158_p11, 1, 0 }
  0x1b   : > { %s1421_s0 = sld [smem:[#allocation15_spill]]  ;;  %s195_s11 = scalar_lea.vmem [#allocation2], %s736_s6 }
  0x1c   : > { %s203_s12 = sshll.u32 %s195_s11, 4  ;;  %p1182_p0 = pnand %p802_p13, %p1137_p4  ;;  %s1178_s12 = int_to_ptr.vmem [resolvable:$true] %s203_s12 }
  0x1d   : > { %s192_s14 = scalar_lea.sflag [#allocation3], %s1165_s5 }
  0x1e   : > { %p856_p5 = pneg %p1182_p0 }
  0x21   : > { %s1174_s10 = scalar_lea.hbm %s1421_s0, %s737_s7  ;;  %s859_s25 = scalar_lea.hbm %s1421_s0, 256 }
  0x22   : > { %s854_s24 = scalar_lea.hbm %s1174_s10, 128  ;;  %p860_p4 = scmp.lt.u32.totalorder %s1174_s10, %s1421_s0 }
  0x23   : > { %p855_p3 = scmp.ne.s32.totalorder %s1174_s10, %s854_s24  ;;  %p861_p10 = scmp.lt.u32.totalorder %s859_s25, %s854_s24 }
  0x24   : > { %p863_p12 = scmp.lt.u32.totalorder %s854_s24, %s1174_s10 }
  0x25   : > { %p857_p6 = pnand %p856_p5, %p855_p3  ;;  %p862_p13 = por %p861_p10, %p860_p4 }
  0x27   : > { %p858_p7 = pneg %p857_p6  ;;  %p864_p1 = por %p863_p12, %p862_p13 }
  0x29   : > { %p865_p2 = pnand %p864_p1, %p858_p7 }
  0x2b   : > { %868 = shalt.err (!%p865_p2)
}
  0x2c   : > { %s869_s22 = scalar_lea.vmem %s1178_s12, 128  ;;  %s1062_s26 = smov [#allocation2]  }
  0x2d   : > { %p870_p3 = scmp.ne.s32.totalorder %s1178_s12, %s869_s22  ;;  %s874_s8 = sshll.u32 %s1062_s26, 4  ;;  %s875_s8 = int_to_ptr.vmem [resolvable:$false] %s874_s8 }
  0x2e   : > { %s876_s9 = scalar_lea.vmem %s875_s8, 256  ;;  %p877_p9 = scmp.lt.s32.totalorder %s1178_s12, %s875_s8 }
  0x2f   : > { %p872_p6 = pnand %p870_p3, %p856_p5  ;;  %p878_p4 = scmp.lt.s32.totalorder %s876_s9, %s869_s22 }
  0x31   : > { %p873_p11 = pneg %p872_p6  ;;  %p879_p10 = por %p878_p4, %p877_p9 }
  0x33   : > { %p880_p12 = pnand %p879_p10, %p873_p11 }
  0x35   : > { %883 = shalt.err (!%p880_p12)
}
  0x36   : > { %788 = dma.hbm_to_vmem [thread:$0]  (!%p1182_p0), %s1174_s10, 128, %s1178_s12, %s192_s14  }
  0x37   : > { %p1423_p1 = scmp.lt.s32.totalorder %s1060_s20, 3  ;;  %p1424_p2 = scmp.ge.s32.totalorder %s1060_s20, 1 }
  0x38   : > { %s1227_s11 = scalar_lea.hbm %s1409_s1, %s737_s7  ;;  %s214_s26 = scalar_lea.vmem [#allocation5], %s736_s6 }
  0x39   : > { %p1218_p7 = pnand %p1424_p2, %p1423_p1  ;;  %s222_s8 = sshll.u32 %s214_s26, 4  ;;  %s223_s8 = int_to_ptr.vmem [resolvable:$true] %s222_s8 }
  0x3a   : > { %s211_s10 = scalar_lea.sflag [#allocation6], %s1165_s5  ;;  %s884_s12 = scalar_lea.hbm %s1227_s11, 128 }
  0x3b   : > { %s1425_s24 = scalar_select %p1218_p7, 1, 0 }
  0x3c   : > { %p885_p9 = scmp.ne.s32.totalorder %s1227_s11, %s884_s12  ;;  %s889_s7 = scalar_lea.hbm %s1409_s1, 256 }
  0x3d   : > { %p890_p3 = scmp.lt.u32.totalorder %s1227_s11, %s1409_s1  ;;  %p891_p6 = scmp.lt.u32.totalorder %s889_s7, %s884_s12 }
  0x3e   : > { %p887_p11 = pnand %p885_p9, %p856_p5  ;;  %p893_p10 = scmp.lt.u32.totalorder %s884_s12, %s1227_s11 }
  0x3f   : > { %p892_p4 = por %p891_p6, %p890_p3 }
  0x40   : > { %p888_p13 = pneg %p887_p11 }
  0x41   : > { %p894_p12 = por %p893_p10, %p892_p4 }
  0x43   : > { %p895_p1 = pnand %p894_p12, %p888_p13 }
  0x45   : > { %898 = shalt.err (!%p895_p1)
}
  0x46   : > { %s899_s5 = scalar_lea.vmem %s223_s8, 128  ;;  %s1063_s6 = smov [#allocation5]  }
  0x47   : > { %p900_p2 = scmp.ne.s32.totalorder %s223_s8, %s899_s5  ;;  %s904_s26 = sshll.u32 %s1063_s6, 4  ;;  %s905_s26 = int_to_ptr.vmem [resolvable:$false] %s904_s26 }
  0x48   : > { %s906_s14 = scalar_lea.vmem %s905_s26, 256  ;;  %p907_p8 = scmp.lt.s32.totalorder %s223_s8, %s905_s26 }
  0x49   : > { %p902_p9 = pnand %p900_p2, %p856_p5  ;;  %p908_p7 = scmp.lt.s32.totalorder %s906_s14, %s899_s5 }
  0x4b   : > { %p903_p11 = pneg %p902_p9  ;;  %p909_p3 = por %p908_p7, %p907_p8 }
  0x4d   : > { %p910_p6 = pnand %p909_p3, %p903_p11 }
  0x4f   : > { %913 = shalt.err (!%p910_p6)
}
  0x50   : > { %791 = dma.hbm_to_vmem [thread:$0]  (!%p1182_p0), %s1227_s11, 128, %s223_s8, %s211_s10  }
  0x51   : > { %p1426_p13 = scmp.ne.s32.totalorder %s1425_s24, 0 }
  0x52   : > { %s1254_s12 = sand.u32 (!%p1426_p13), 1, %s1044_s16   ;;  %p1427_p8 = scmp.ne.s32.totalorder (!%p1426_p13), %s1418_s27, 0 }
  0x53   : > { %231 = sbr.rel (%p1426_p13) target bundleno = 378 (0x17a), region = 28  ;;  %s1257_s9 = sshll.u32 (!%p1426_p13), %s1254_s12, 3 }
  0x54   : > { %s234_s7 = scalar_lea.sflag (!%p1426_p13), [#allocation3], %s1254_s12  ;;  %s237_s22 = scalar_lea.vmem (!%p1426_p13), [#allocation2], %s1257_s9 }
  0x5a   : > { %1023 = dma.done.wait (%p1427_p8), %s234_s7, 128  }
  0x5b   : > { %1025 = vsyncadd (%p1427_p8), %s234_s7, 4294967168  ;;  %s243_s13 = scalar_lea.sflag [#allocation6], %s1254_s12  ;;  %s246_s24 = scalar_lea.vmem [#allocation5], %s1257_s9 }
  0x5c   : > { %1027 = dma.done.wait (%p1427_p8), %s243_s13, 128  }
  0x5d   : > { %1029 = vsyncadd (%p1427_p8), %s243_s13, 4294967168  ;;  %vm292_vm0 = vcmask 64512   ;;  %v1064_v0 = vmov 0.0   ;;  %vm1065_vm1 = vmmov 0   ;;  %s1272_s11 = scalar_lea.vmem [#allocation7], %s1257_s9  ;;  %v296_v1 = vld [vmem:[%s237_s22] sm:$0xff] }
  0x5e   : > { %760 = vmatprep.subr.mxu0 %v1064_v0  ;;  %762 = vmatprep.mubr.msk.f32.mxu0 %vm1065_vm1, %v1064_v0  ;;  %293 = vst.msk [vmem:[%s1272_s11] sm:$0xff] %vm292_vm0, %v1064_v0  ;;  %v297_v2 = vld [vmem:[%s246_s24] sm:$0xff]  ;;  %s278_s27 = scalar_lea.vmem [#allocation8], %s1257_s9  ;;  %s1279_s8 = scalar_lea.vmem [#allocation10], %s1257_s9 }
  0x5f   : > { %765 = vmatprep.subr.mxu1 %v1064_v0  ;;  %767 = vmatprep.mubr.msk.f32.mxu1 %vm1065_vm1, %v1064_v0  ;;  %294 = vst.msk [vmem:[%s278_s27] sm:$0xff] %vm292_vm0, %v1064_v0  ;;  %295 = vst.msk [vmem:[%s1279_s8] sm:$0xff] %vm292_vm0, %v1064_v0  ;;  %s523_s10 = sand.u32 1, %s1125_s21   ;;  %s749_s25 = sshll.u32 %s1052_s18, 7 }
  0x60   : > { %761 = vmatpush3.xpose.msra.mxu0 %v296_v1  ;;  %766 = vmatpush3.xpose.msra.mxu1 %v297_v2  ;;  %s555_s5 = sshll.u32 %s278_s27, 4  ;;  %s542_s6 = sshll.u32 %s1272_s11, 4  ;;  %s1293_s5 = int_to_ptr.vmem [resolvable:$true] %s555_s5  ;;  %s1301_s6 = int_to_ptr.vmem [resolvable:$true] %s542_s6 }
  0x61   : > { %770 = vmatprep.subr.mxu0 %v1064_v0  ;;  %s1290_s7 = scalar_lea.hbm %s1411_s3, %s749_s25  ;;  %s568_s9 = sshll.u32 %s1279_s8, 4  ;;  %s1311_s9 = int_to_ptr.vmem [resolvable:$true] %s568_s9 }
  0x62   : > { %s1299_s22 = scalar_lea.hbm %s1410_s2, %s749_s25  ;;  %s1309_s26 = scalar_lea.hbm %s1412_s4, %s749_s25 }
  0x63   : > { %763 = vmatmul.mubr.f32.vlgmr.msra.gmra.mrb[0].mxu0 %v296_v1  ;;  %768 = vmatmul.mubr.f32.vlgmr.msra.gmra.mrb[0].mxu1 %v296_v1  ;;  %s1313_s14 = scalar_lea.sflag [#allocation9], %s523_s10  ;;  %s914_s18 = scalar_lea.vmem %s1293_s5, 128 }
  0x64   : > { %771 = vmatpush3.xpose.msra.mxu0 %v297_v2  ;;  %772 = vmatprep.mubr.msk.f32.mxu0 %vm1065_vm1, %v1064_v0  ;;  %p915_p0 = scmp.ne.s32.totalorder %s1293_s5, %s914_s18  ;;  %p1428_p5 = scmp.ne.s32.totalorder %s1419_s28, 0 }
  0x65   : > { %v298_v3 = vld [vmem:[%s1272_s11] sm:$0xff]  ;;  %s1066_s21 = smov [#allocation8]  }
  0x66   : > { %v372_v4 = vld [vmem:[%s278_s27] sm:$0xff]  ;;  %v445_v11 = vld [vmem:[%s1279_s8] sm:$0xff]  ;;  %p916_p7 = pnand %p915_p0, %p1428_p5  ;;  %s918_s0 = sshll.u32 %s1066_s21, 4  ;;  %s919_s0 = int_to_ptr.vmem [resolvable:$false] %s918_s0 }
  0x67   : > { %773 = vmatmul.mubr.f32.vlgmr.msra.gmra.mrb[2].mxu0 %v297_v2  ;;  %p921_p10 = scmp.lt.s32.totalorder %s1293_s5, %s919_s0 }
  0x68   : > { %p917_p4 = pneg %p916_p7 }
 0x136   : > { %v365_v5 = vpop.f32.mrb[0].mxu0  ;;  %v439_v6 = vpop.f32.mrb[0].mxu1 }
 0x137   : > { %v369_v7 = vadd.f32 %v365_v5, %v298_v3  ;;  %v764_v8 = vpop.f32.mrb[1].mxu0  ;;  %v443_v9 = vadd.f32 %v439_v6, %v372_v4  ;;  %v769_v10 = vpop.f32.mrb[1].mxu1 }
 0x139   : > { %371 = vst.msk [vmem:[%s1272_s11] sm:$0xff] %vm292_vm0, %v369_v7  ;;  %444 = vst.msk [vmem:[%s278_s27] sm:$0xff] %vm292_vm0, %v443_v9  ;;  %s920_s11 = scalar_lea.vmem %s919_s0, 256 }
 0x13a   : > { %v512_v12 = vpop.f32.mrb[2].mxu0  ;;  %p922_p12 = scmp.lt.s32.totalorder %s920_s11, %s914_s18 }
 0x13c   : > { %p923_p1 = por %p922_p12, %p921_p10 }
 0x13e   : > { %p924_p2 = pnand %p923_p1, %p917_p4 }
 0x140   : > { %927 = shalt.err (!%p924_p2)
}
 0x141   : > { %s928_s27 = scalar_lea.hbm %s1290_s7, 128  ;;  %s932_s13 = scalar_lea.hbm %s1411_s3, 256 }
 0x142   : > { %p929_p9 = scmp.ne.s32.totalorder %s1290_s7, %s928_s27  ;;  %p933_p6 = scmp.lt.u32.totalorder %s1290_s7, %s1411_s3 }
 0x143   : > { %p934_p13 = scmp.lt.u32.totalorder %s932_s13, %s928_s27  ;;  %p936_p0 = scmp.lt.u32.totalorder %s928_s27, %s1290_s7 }
 0x144   : > { %p930_p11 = pnand %p929_p9, %p1428_p5 }
 0x145   : > { %p935_p8 = por %p934_p13, %p933_p6 }
 0x146   : > { %p931_p3 = pneg %p930_p11 }
 0x147   : > { %p937_p7 = por %p936_p0, %p935_p8 }
 0x149   : > { %p938_p4 = pnand %p937_p7, %p931_p3 }
 0x14b   : > { %941 = shalt.err (!%p938_p4)
}
 0x14c   : > { %780 = dma.vmem_to_hbm [thread:$0]  (%p1428_p5), %s1293_s5, 128, %s1290_s7, %s1313_s14   ;;  %v516_v13 = vadd.f32 %v512_v12, %v445_v11  ;;  %v774_v14 = vpop.f32.mrb[3].mxu0 }
 0x14d   : > { %s519_s18 = scalar_lea.sflag [#allocation4], %s1254_s12  ;;  %s942_s21 = scalar_lea.vmem %s1301_s6, 128 }
 0x14e   : > { %p943_p10 = scmp.ne.s32.totalorder %s1301_s6, %s942_s21  ;;  %s1067_s11 = smov [#allocation7]  }
 0x14f   : > { %s946_s27 = sshll.u32 %s1067_s11, 4  ;;  %s947_s27 = int_to_ptr.vmem [resolvable:$false] %s946_s27 }
 0x150   : > { %p944_p12 = pnand %p943_p10, %p1428_p5  ;;  %s948_s10 = scalar_lea.vmem %s947_s27, 256 }
 0x151   : > { %p949_p2 = scmp.lt.s32.totalorder %s1301_s6, %s947_s27  ;;  %p950_p9 = scmp.lt.s32.totalorder %s948_s10, %s942_s21 }
 0x152   : > { %p945_p1 = pneg %p944_p12 }
 0x153   : > { %p951_p11 = por %p950_p9, %p949_p2 }
 0x155   : > { %p952_p3 = pnand %p951_p11, %p945_p1 }
 0x157   : > { %955 = shalt.err (!%p952_p3)
}
 0x158   : > { %s956_s12 = scalar_lea.hbm %s1299_s22, 128  ;;  %s960_s25 = scalar_lea.hbm %s1410_s2, 256 }
 0x159   : > { %p957_p6 = scmp.ne.s32.totalorder %s1299_s22, %s956_s12  ;;  %p961_p0 = scmp.lt.u32.totalorder %s1299_s22, %s1410_s2 }
 0x15a   : > { %p962_p7 = scmp.lt.u32.totalorder %s960_s25, %s956_s12  ;;  %p964_p10 = scmp.lt.u32.totalorder %s956_s12, %s1299_s22 }
 0x15b   : > { %p958_p13 = pnand %p957_p6, %p1428_p5 }
 0x15c   : > { %p963_p4 = por %p962_p7, %p961_p0 }
 0x15d   : > { %p959_p8 = pneg %p958_p13 }
 0x15e   : > { %p965_p12 = por %p964_p10, %p963_p4 }
 0x160   : > { %p966_p1 = pnand %p965_p12, %p959_p8 }
 0x162   : > { %969 = shalt.err (!%p966_p1)
}
 0x163   : > { %779 = dma.vmem_to_hbm [thread:$0]  (%p1428_p5), %s1301_s6, 128, %s1299_s22, %s519_s18   ;;  %517 = vst.msk [vmem:[%s1279_s8] sm:$0xff] %vm292_vm0, %v516_v13 }
 0x164   : > { %s970_s0 = scalar_lea.vmem %s1311_s9, 128  ;;  %s1068_s21 = smov [#allocation10]  }
 0x165   : > { %p971_p2 = scmp.ne.s32.totalorder %s1311_s9, %s970_s0  ;;  %s974_s11 = sshll.u32 %s1068_s21, 4  ;;  %s975_s11 = int_to_ptr.vmem [resolvable:$false] %s974_s11 }
 0x166   : > { %s976_s27 = scalar_lea.vmem %s975_s11, 256  ;;  %p977_p3 = scmp.lt.s32.totalorder %s1311_s9, %s975_s11 }
 0x167   : > { %p972_p9 = pnand %p971_p2, %p1428_p5  ;;  %p978_p6 = scmp.lt.s32.totalorder %s976_s27, %s970_s0 }
 0x169   : > { %p973_p11 = pneg %p972_p9  ;;  %p979_p13 = por %p978_p6, %p977_p3 }
 0x16b   : > { %p980_p8 = pnand %p979_p13, %p973_p11 }
 0x16d   : > { %983 = shalt.err (!%p980_p8)
}
 0x16e   : > { %s984_s8 = scalar_lea.hbm %s1309_s26, 128  ;;  %s988_s18 = scalar_lea.hbm %s1412_s4, 256 }
 0x16f   : > { %p985_p0 = scmp.ne.s32.totalorder %s1309_s26, %s984_s8  ;;  %p989_p10 = scmp.lt.u32.totalorder %s1309_s26, %s1412_s4 }
 0x170   : > { %p990_p12 = scmp.lt.u32.totalorder %s988_s18, %s984_s8  ;;  %p992_p2 = scmp.lt.u32.totalorder %s984_s8, %s1309_s26 }
 0x171   : > { %p986_p7 = pnand %p985_p0, %p1428_p5 }
 0x172   : > { %p991_p1 = por %p990_p12, %p989_p10 }
 0x173   : > { %p987_p4 = pneg %p986_p7 }
 0x174   : > { %p993_p9 = por %p992_p2, %p991_p1 }
 0x176   : > { %p994_p11 = pnand %p993_p9, %p987_p4 }
 0x178   : > { %997 = shalt.err (!%p994_p11)
}
 0x179   : > { %781 = dma.vmem_to_hbm [thread:$0]  (%p1428_p5), %s1311_s9, 128, %s1309_s26, %s1313_s14  }
 0x17a PF: > { %s580_s5 = sand.u32 1, %s1040_s15   ;;  %p1429_p3 = scmp.ne.s32.totalorder %s1420_s30, 0 }
 0x17b   : > { %p1430_p6 = scmp.ge.s32.totalorder %s1060_s20, 2  ;;  %s581_s7 = scalar_lea.sflag [#allocation4], %s580_s5 }
 0x17d   : > { %p793_p13 = pnand %p1430_p6, %p1429_p3 }
 0x17f   : > { %1031 = dma.done.wait (!%p793_p13), %s581_s7, 128  }
 0x180   : > { %1033 = vsyncadd (!%p793_p13), %s581_s7, 4294967168  ;;  %s1431_s25 = sadd.s32 4294967294, %s1060_s20  }
 0x181   : > { %s589_s13 = sand.u32 1, %s1431_s25  }
 0x182   : > { %s590_s24 = scalar_lea.sflag [#allocation9], %s589_s13 }
 0x183   : > { %1035 = dma.done.wait (!%p793_p13), %s590_s24, 256  }
 0x184   : > { %1037 = vsyncadd (!%p793_p13), %s590_s24, 4294967040  ;;  %s27_s20 = sadd.s32 1, %s1060_s20   ;;  %s1432_s15 = smov %s1044_s16 }
 0x185   : > { %p24_p5 = scmp.ge.s32.totalorder %s27_s20, 4   ;;  %s1433_s16 = smov %s1048_s17 }
 0x186   : > { %s1434_s17 = smov %s1156_s29  ;;  %s1435_s18 = smov %s1056_s19 }
 0x187   : > { %s1436_s19 = smov %s1438_s23  ;;  %26 = sbr.rel (!%p24_p5) target bundleno = 12 (0xc), region = 122 }
 0x18e   :  { %604 = vsyncpa [#allocation3], 1 }
 0x18f   :  { %606 = vsyncpa [#allocation3 + $0x1], 1 }
 0x190   :  { %607 = vsyncpa [#allocation6], 1 }
 0x191   :  { %609 = vsyncpa [#allocation6 + $0x1], 1 }
 0x192   :  { %610 = vsyncpa [#allocation4], 1 }
 0x193   :  { %612 = vsyncpa [#allocation4 + $0x1], 1 }
 0x194   :  { %613 = vsyncpa [#allocation9], 1 }
 0x195   :  { %615 = vsyncpa [#allocation9 + $0x1], 1 }

</bundles_post_ra>
